<compile_context>
chip_gen: v5e
topology: v5e:2x2
jax: 0.10.0
libtpu: 0.0.40
codegen_flags: <defaults>
</compile_context>

<pallas_src>
import jax
import jax.numpy as jnp
from jax import lax
from jax.experimental import pallas as pl
from jax.experimental.pallas import tpu as pltpu


def _round_up(x, m):
    return ((x + m - 1) // m) * m


def _vmem_capacity_bytes():
    """Physical VMEM per TensorCore, with a conservative fallback."""
    try:
        info = pltpu.get_tpu_info()
        cap = int(getattr(info, "vmem_capacity_bytes", 0) or 0)
        if cap > 0:
            return cap
    except Exception:
        pass
    return 64 * 1024 * 1024  # v7x per-core size: safe lower bound on all gens


def _footprint_bytes(bt, tq, s_rows, s_lane, d, r):
    """Per-grid-step VMEM footprint (conservative, f32 accounting).

    Counts the double-buffered emb / proj / out blocks, the projected-sequence
    and squared-norm scratches, and live intermediates (p_all, gram, dist).
    Lane dims are rounded to 128 and sublane dims to 8 to match physical VMEM
    tiling.
    """
    f32 = 4
    d_l, r_l = _round_up(d, 128), _round_up(r, 128)
    emb = 2 * bt * s_rows * d_l * f32                       # input block, 2x buffered
    prj = 2 * _round_up(d, 8) * r_l * f32                   # proj.T, 2x buffered
    out = 2 * bt * tq * s_lane * f32                        # output block, 2x buffered
    p_scr = bt * s_lane * r_l * f32                         # projected-sequence scratch
    sq_scr = bt * 8 * s_lane * f32                          # ||p_j||^2 scratch
    temps = bt * (3 * tq * s_lane + s_rows * r_l + 2 * tq * r_l) * f32
    return emb + prj + out + p_scr + sq_scr + temps


def _choose_tiles(B, S, D, R, budget):
    """Pick (batch_tile, row_tile, padded_rows, padded_lane_cols)."""
    s_sub = _round_up(S, 8)       # sublane padding only
    s_lane = _round_up(S, 128)    # lane padding (output last dim / Gram cols)

    def fits(bt, tq, s_rows):
        return _footprint_bytes(bt, tq, s_rows, s_lane, D, R) <= budget

    # 1) No row tiling: fold as many batch elements as fit into one step, but
    #    only divisors of B (no dead padded tiles) and <= B//2 when B >= 2 so
    #    the grid has >= 2 steps (v7x megacore + pipeline overlap).
    bt_cap = B if B == 1 else max(1, B // 2)
    for bt in range(bt_cap, 0, -1):
        if B % bt == 0 and fits(bt, s_sub, s_sub):
            return bt, s_sub, s_sub, s_lane

    # 2) Row-tile the distance matrix (bt = 1).  tq is a multiple of 8 that
    #    divides s_lane, so padded rows never exceed s_lane.
    for tq in (1024, 512, 256, 128, 64, 32, 16, 8):
        if tq > s_sub or s_lane % tq != 0:
            continue
        s_rows = _round_up(S, tq)
        if fits(1, tq, s_rows):
            return 1, tq, s_rows, s_lane

    # TODO(synk): add column tiling (full 2-D tiling of the distance matrix)
    # for extreme S where even one 8-row block plus the projected sequence
    # overflows VMEM.
    return 1, 8, s_sub, s_lane


def _make_kernel(s_rows, s_lane, tq):
    def kernel(emb_ref, projT_ref, out_ref, p_scr, sq_scr):
        # emb_ref:   (bt, s_rows, D)   full (padded) sequence of this batch tile
        # projT_ref: (D, R)            probe projection, resident every step
        # out_ref:   (bt, tq, s_lane)  one row-block of squared distances
        # p_scr:     (bt, s_lane, R)   projected sequence (zero-padded cols)
        # sq_scr:    (bt, 1, s_lane)   ||p_j||^2 laid out along lanes
        q = pl.program_id(1)

        @pl.when(q == 0)
        def _():
            # Project the whole (padded) sequence once per batch tile:
            # (bt, s_rows, D) @ (D, R) -> (bt, s_rows, R), f32 accumulate.
            p_all = lax.dot_general(
                emb_ref[...], projT_ref[...],
                dimension_numbers=(((2,), (0,)), ((), ())),
                preferred_element_type=jnp.float32)
            if s_rows == s_lane:
                p_scr[...] = p_all
            else:
                p_scr[...] = jnp.zeros_like(p_scr)
                p_scr[:, :s_rows, :] = p_all
            # Column squared norms, computed once per batch tile.
            sq_scr[...] = jnp.sum(p_scr[...] * p_scr[...], axis=-1)[:, None, :]

        row0 = pl.multiple_of(q * tq, tq)
        p_rows = p_scr[:, pl.ds(row0, tq), :]                        # (bt, tq, R)
        sq_rows = jnp.sum(p_rows * p_rows, axis=-1, keepdims=True)   # (bt, tq, 1)

        # 2*Gram block; factor 2 folded into the small row operand so we skip
        # one (tq, s_lane)-sized VPU multiply per step.
        gram2 = lax.dot_general(
            p_rows + p_rows, p_scr[...],
            dimension_numbers=(((2,), (2,)), ((0,), (0,))),
            preferred_element_type=jnp.float32)                      # (bt, tq, s_lane)

        dist = (sq_rows + sq_scr[...]) - gram2
        # Gram-form cancellation can yield tiny negatives -> clamp at 0.
        out_ref[...] = jnp.maximum(dist, 0.0).astype(out_ref.dtype)

    return kernel


def euclidean_distance_probe(embeddings: jax.Array, proj: jax.Array, *,
                             compute_dtype=jnp.float32) -> jax.Array:
    """embeddings: (B, S, D), proj: (R, D) -> (B, S, S) float32 squared distances."""
    B, S, D = embeddings.shape
    R, D2 = proj.shape
    assert D == D2, "proj second dim must match input_dim"

    cap = _vmem_capacity_bytes()
    budget = int(cap * 0.70)                       # generation-aware working budget
    bt, tq, s_rows, s_lane = _choose_tiles(B, S, D, R, budget)

    fp = _footprint_bytes(bt, tq, s_rows, s_lane, D, R)
    vmem_limit = int(min(max(1.4 * fp + (4 << 20), 32 << 20), 0.9 * cap))
    vmem_limit = max(vmem_limit, int(1.2 * fp))

    emb_p = embeddings.astype(compute_dtype)
    if s_rows != S:  # sublane-only padding of the sequence axis (zeros are inert)
        emb_p = jnp.zeros((B, s_rows, D), compute_dtype).at[:, :S, :].set(emb_p)
    projT_p = proj.T.astype(compute_dtype)         # (D, R): no in-kernel transpose

    grid = (B // bt, s_rows // tq)
    grid_spec = pltpu.PrefetchScalarGridSpec(
        num_scalar_prefetch=0,
        grid=grid,
        in_specs=[
            # Whole (padded) sequence of one batch tile; block index is
            # constant across the row axis so it is fetched once per tile.
            pl.BlockSpec((bt, s_rows, D), lambda b, q: (b, 0, 0)),
            # Probe projection matrix, resident for every grid step.
            pl.BlockSpec((D, R), lambda b, q: (0, 0)),
        ],
        out_specs=pl.BlockSpec((bt, tq, s_lane), lambda b, q: (b, q, 0)),
        scratch_shapes=[
            pltpu.VMEM((bt, s_lane, R), jnp.float32),   # projected sequence
            pltpu.VMEM((bt, 1, s_lane), jnp.float32),   # ||p_j||^2 along lanes
        ],
    )

    out = pl.pallas_call(
        _make_kernel(s_rows, s_lane, tq),
        out_shape=jax.ShapeDtypeStruct((B, s_rows, s_lane), jnp.float32),
        grid_spec=grid_spec,
        compiler_params=pltpu.CompilerParams(
            dimension_semantics=("parallel", "arbitrary"),
            vmem_limit_bytes=vmem_limit,
        ),
    )(emb_p, projT_p)

    return out[:, :S, :S]


def reference(embeddings, proj):
    # Direct pairwise-difference form, identical to the PyTorch forward.
    projected = jnp.einsum("bsd,rd->bsr", embeddings, proj)
    diff = projected[:, :, None, :] - projected[:, None, :, :]
    return jnp.sum(diff * diff, axis=-1)


if __name__ == "__main__":
    # Small shapes consistent with the module: batch=2, seq=8, input_dim=32, probe_rank=16
    B, S, D, R = 2, 8, 32, 16

    key = jax.random.PRNGKey(0)
    k_emb, k_proj = jax.random.split(key)

    embeddings = jax.random.normal(k_emb, (B, S, D), dtype=jnp.float32)
    # nn.init.uniform_(proj, -0.05, 0.05) -> deterministic uniform init here
    proj = jax.random.uniform(k_proj, (R, D), dtype=jnp.float32,
                              minval=-0.05, maxval=0.05)

    out = jax.block_until_ready(euclidean_distance_probe(embeddings, proj))

    ref = reference(embeddings, proj)
    assert out.shape == (B, S, S)
    # Gram-matrix formulation differs from the pairwise-difference form only
    # by f32 rounding/cancellation at these magnitudes.
    assert jnp.allclose(out, ref, atol=1e-4, rtol=1e-4), "mismatch vs reference"

    print("KERNEL_OK")
</pallas_src>

<mosaic_0001>
module attributes {stable_mosaic.version = 11 : i64} {
  func.func @kernel(%arg0: i32, %arg1: i32, %arg2: memref<1x8x32xf32, #tpu.memory_space<vmem>>, %arg3: memref<32x16xf32, #tpu.memory_space<vmem>>, %arg4: memref<1x8x128xf32, #tpu.memory_space<vmem>>, %arg5: memref<1x128x16xf32, #tpu.memory_space<vmem>>, %arg6: memref<1x1x128xf32, #tpu.memory_space<vmem>>) attributes {dimension_semantics = [#tpu.dimension_semantics<parallel>, #tpu.dimension_semantics<arbitrary>], iteration_bounds = array<i64: 2, 1>, scalar_prefetch = 0 : i64, scratch_operands = 2 : i64, tpu.core_type = #tpu.core_type<tc>, window_params = [{transform_indices = @transform_0, window_bounds = array<i64: 1, 8, 32>}, {pipeline_mode = #tpu.pipeline_mode<synchronous>, transform_indices = @transform_1, window_bounds = array<i64: 32, 16>}, {transform_indices = @transform_2, window_bounds = array<i64: 1, 8, 128>}]} {
    %c0_i32 = arith.constant 0 : i32
    %0 = arith.cmpi eq, %arg1, %c0_i32 : i32
    %1 = arith.extui %0 : i1 to i32
    %c0_i32_0 = arith.constant 0 : i32
    %2 = arith.cmpi ne, %1, %c0_i32_0 : i32
    scf.if %2 {
      %c0_13 = arith.constant 0 : index
      %c0_14 = arith.constant 0 : index
      %c0_15 = arith.constant 0 : index
      %21 = vector.load %arg2[%c0_13, %c0_14, %c0_15] : memref<1x8x32xf32, #tpu.memory_space<vmem>>, vector<1x8x32xf32>
      %c0_16 = arith.constant 0 : index
      %c0_17 = arith.constant 0 : index
      %22 = vector.load %arg3[%c0_16, %c0_17] : memref<32x16xf32, #tpu.memory_space<vmem>>, vector<32x16xf32>
      %cst_18 = arith.constant dense<0.000000e+00> : vector<1x8x16xf32>
      %23 = tpu.matmul %21, %22, %cst_18 {dimension_numbers = #tpu.dot_dimension_numbers<[2], [0], [0, 1], [1], [0, 0, 0, 1, 1, 1], [], []>} : vector<1x8x32xf32>, vector<32x16xf32>, vector<1x8x16xf32> -> vector<1x8x16xf32>
      %cst_19 = arith.constant 0.000000e+00 : f32
      %24 = vector.broadcast %cst_19 : f32 to vector<1x128x16xf32>
      %c0_20 = arith.constant 0 : index
      %c0_21 = arith.constant 0 : index
      %c0_22 = arith.constant 0 : index
      %25 = vector.load %arg5[%c0_20, %c0_21, %c0_22] : memref<1x128x16xf32, #tpu.memory_space<vmem>>, vector<1x128x16xf32>
      tpu.vector_store %arg5[%c0_20, %c0_21, %c0_22], %24 {strides = array<i32>} : memref<1x128x16xf32, #tpu.memory_space<vmem>>, vector<1x128x16xf32>,
      %c0_23 = arith.constant 0 : index
      %c0_24 = arith.constant 0 : index
      %c0_25 = arith.constant 0 : index
      %26 = vector.load %arg5[%c0_23, %c0_24, %c0_25] : memref<1x128x16xf32, #tpu.memory_space<vmem>>, vector<1x8x16xf32>
      tpu.vector_store %arg5[%c0_23, %c0_24, %c0_25], %23 {strides = array<i32>} : memref<1x128x16xf32, #tpu.memory_space<vmem>>, vector<1x8x16xf32>,
      %c0_26 = arith.constant 0 : index
      %c0_27 = arith.constant 0 : index
      %c0_28 = arith.constant 0 : index
      %27 = vector.load %arg5[%c0_26, %c0_27, %c0_28] : memref<1x128x16xf32, #tpu.memory_space<vmem>>, vector<1x128x16xf32>
      %c0_29 = arith.constant 0 : index
      %c0_30 = arith.constant 0 : index
      %c0_31 = arith.constant 0 : index
      %28 = vector.load %arg5[%c0_29, %c0_30, %c0_31] : memref<1x128x16xf32, #tpu.memory_space<vmem>>, vector<1x128x16xf32>
      %29 = arith.mulf %27, %28 : vector<1x128x16xf32>
      %cst_32 = arith.constant dense<0.000000e+00> : vector<1x128xf32>
      %30 = vector.multi_reduction <add>, %29, %cst_32 [2] : vector<1x128x16xf32> to vector<1x128xf32>
      %31 = vector.shape_cast %30 : vector<1x128xf32> to vector<1x1x128xf32>
      %c0_33 = arith.constant 0 : index
      %c0_34 = arith.constant 0 : index
      %c0_35 = arith.constant 0 : index
      %32 = vector.load %arg6[%c0_33, %c0_34, %c0_35] : memref<1x1x128xf32, #tpu.memory_space<vmem>>, vector<1x1x128xf32>
      tpu.vector_store %arg6[%c0_33, %c0_34, %c0_35], %31 {strides = array<i32>} : memref<1x1x128xf32, #tpu.memory_space<vmem>>, vector<1x1x128xf32>,
    } else {
    }
    %c8_i32 = arith.constant 8 : i32
    %3 = arith.muli %arg1, %c8_i32 : i32
    %4 = tpu.assume_multiple %3, 8 : i32
    %c0 = arith.constant 0 : index
    %5 = arith.index_cast %4 : i32 to index
    %c0_1 = arith.constant 0 : index
    %6 = vector.load %arg5[%c0, %5, %c0_1] : memref<1x128x16xf32, #tpu.memory_space<vmem>>, vector<1x8x16xf32>
    %7 = arith.mulf %6, %6 : vector<1x8x16xf32>
    %cst = arith.constant dense<0.000000e+00> : vector<1x8xf32>
    %8 = vector.multi_reduction <add>, %7, %cst [2] : vector<1x8x16xf32> to vector<1x8xf32>
    %9 = vector.shape_cast %8 : vector<1x8xf32> to vector<1x8x1xf32>
    %10 = arith.addf %6, %6 : vector<1x8x16xf32>
    %c0_2 = arith.constant 0 : index
    %c0_3 = arith.constant 0 : index
    %c0_4 = arith.constant 0 : index
    %11 = vector.load %arg5[%c0_2, %c0_3, %c0_4] : memref<1x128x16xf32, #tpu.memory_space<vmem>>, vector<1x128x16xf32>
    %cst_5 = arith.constant dense<0.000000e+00> : vector<1x8x128xf32>
    %12 = tpu.matmul %10, %11, %cst_5 {dimension_numbers = #tpu.dot_dimension_numbers<[2], [2], [1], [1], [0, 0, 0, 1, 1, 1], [0], [0]>} : vector<1x8x16xf32>, vector<1x128x16xf32>, vector<1x8x128xf32> -> vector<1x8x128xf32>
    %c0_6 = arith.constant 0 : index
    %c0_7 = arith.constant 0 : index
    %c0_8 = arith.constant 0 : index
    %13 = vector.load %arg6[%c0_6, %c0_7, %c0_8] : memref<1x1x128xf32, #tpu.memory_space<vmem>>, vector<1x1x128xf32>
    %14 = vector.broadcast %9 : vector<1x8x1xf32> to vector<1x8x128xf32>
    %15 = vector.broadcast %13 : vector<1x1x128xf32> to vector<1x8x128xf32>
    %16 = arith.addf %14, %15 : vector<1x8x128xf32>
    %17 = arith.subf %16, %12 : vector<1x8x128xf32>
    %cst_9 = arith.constant 0.000000e+00 : f32
    %18 = vector.broadcast %cst_9 : f32 to vector<1x8x128xf32>
    %19 = arith.maximumf %17, %18 : vector<1x8x128xf32>
    %c0_10 = arith.constant 0 : index
    %c0_11 = arith.constant 0 : index
    %c0_12 = arith.constant 0 : index
    %20 = vector.load %arg4[%c0_10, %c0_11, %c0_12] : memref<1x8x128xf32, #tpu.memory_space<vmem>>, vector<1x8x128xf32>
    tpu.vector_store %arg4[%c0_10, %c0_11, %c0_12], %19 {strides = array<i32>} : memref<1x8x128xf32, #tpu.memory_space<vmem>>, vector<1x8x128xf32>,
    return
  }
  func.func @transform_0(%arg0: i32, %arg1: i32) -> (i32, i32, i32) {
    %c0_i32 = arith.constant 0 : i32
    %c0_i32_0 = arith.constant 0 : i32
    %c0_i32_1 = arith.constant 0 : i32
    return %arg0, %c0_i32, %c0_i32_0 : i32, i32, i32
  }
  func.func @transform_1(%arg0: i32, %arg1: i32) -> (i32, i32) {
    %c0_i32 = arith.constant 0 : i32
    %c0_i32_0 = arith.constant 0 : i32
    %c0_i32_1 = arith.constant 0 : i32
    return %c0_i32, %c0_i32_0 : i32, i32
  }
  func.func @transform_2(%arg0: i32, %arg1: i32) -> (i32, i32, i32) {
    %c0_i32 = arith.constant 0 : i32
    %c0_i32_0 = arith.constant 0 : i32
    return %arg0, %arg1, %c0_i32 : i32, i32, i32
  }
}

</mosaic_0001>

<bundles_post_ra>
// kernel: tpu_custom_call.1
= control target key start
LH: loop header
LB: loop body
LE: loop exit
PB: predicated region body
PF: predicated region fallthrough
CT: control target
= control target key end

     0   :  { %7 = vsyncpa [#allocation5], 0  ;;  %s902_s0 = inlined_call_operand.vmem [shape: f32[2,8,32], index: 0, kind: input, shape index: {}]   ;;  %s903_s1 = inlined_call_operand.vmem [shape: f32[32,16], index: 1, kind: input, shape index: {}]   ;;  %s904_s2 = inlined_call_operand.hbm [shape: f32[2,8,128], index: 2, kind: output, shape index: {}]  }
   0x1   :  { %9 = vsyncpa [#allocation5 + $0x1], 0  ;;  %s738_s9 = smov 0   ;;  %s740_s10 = smov 0  }
   0x2   :  { %s742_s11 = smov 0   ;;  %s744_s12 = smov 0  }
   0x3   :  { %s746_s13 = smov 0   ;;  %s748_s14 = smov 0  }
   0x4 LB: > { %s556_s15 = sadd.s32 4294967295, %s720_s14   ;;  %s557_s16 = sadd.s32 4294967294, %s720_s14   ;;  %s720_s14 = sphi %s748_s14, %s15_s14   ;;  %s716_s13 = sphi %s746_s13, %s911_s13   ;;  %s712_s12 = sphi %s744_s12, %s910_s12   ;;  %s708_s11 = sphi %s742_s11, %s909_s11   ;;  %s704_s10 = sphi %s740_s10, %s908_s10   ;;  %s700_s9 = sphi %s738_s9, %s907_s9  }
   0x5   : > { %s27_s17 = sadd.s32 1, %s716_s13  ;;  %s83_s18 = sadd.s32 1, %s708_s11 }
   0x6   : > { %p29_p0 = scmp.ge.s32.totalorder %s27_s17, 2  ;;  %p93_p1 = scmp.ne.s32.totalorder %s708_s11, %s704_s10 }
   0x7   : > { %p94_p2 = scmp.eq.s32.totalorder %s556_s15, 1  ;;  %p99_p3 = scmp.ne.s32.totalorder %s704_s10, %s700_s9 }
   0x8   : > { %s913_s17 = smov (%p29_p0, %s27_s17), 0  ;;  %p100_p5 = scmp.eq.s32.totalorder %s557_s16, 1 }
   0x9   : > { %p778_p4 = por %p94_p2, %p93_p1  ;;  %s78_s20 = ssub.s32 %s716_s13, %s913_s17 }
   0xa   : > { %p560_p6 = scmp.ge.s32.totalorder %s720_s14, 1  ;;  %p81_p7 = scmp.eq.s32.totalorder %s78_s20, 0 }
   0xb   : > { %p785_p8 = por %p100_p5, %p99_p3  ;;  %p128_p9 = scmp.lt.s32.totalorder %s720_s14, 3 }
   0xc   : > { %s791_s22 = scalar_select %p81_p7, %s708_s11, %s83_s18  }
   0xd   : > { %p129_p10 = pnand %p560_p6, %p128_p9 }
   0xe   : > { %p149_p11 = scmp.lt.s32.totalorder (!%p129_p10), %s712_s12, 1  ;;  %s146_s8 = sand.u32 (!%p129_p10), 1, %s704_s10  }
   0xf   : > { %132 = sbr.rel (%p129_p10) target bundleno = 318 (0x13e), region = 28  ;;  %s561_s15 = sshll.u32 (!%p129_p10), %s146_s8, 3 }
  0x10   : > { %s582_s16 = sshll.u32 (!%p129_p10), %s712_s12, 3  ;;  %s148_s24 = scalar_lea.vmem (!%p129_p10), [#allocation4], %s561_s15 }
  0x11   : > { %s481_s23 = scalar_lea.hbm (!%p129_p10), %s904_s2, %s582_s16  ;;  %s483_s25 = sshll.u32 (!%p129_p10), %s148_s24, 4  ;;  %s484_s25 = int_to_ptr.vmem [resolvable:$true] %s483_s25 }
  0x12   : > { %s485_s26 = sshll.u32 (!%p129_p10), %s481_s23, 4  ;;  %s470_s27 = scalar_lea.sflag (!%p129_p10), [#allocation5], %s146_s8  ;;  %s486_s26 = int_to_ptr.hbm [resolvable:$true] %s485_s26 }
  0x13   : > { %s656_s28 = sshra.s32 (!%p129_p10), %s486_s26, 4  ;;  %s662_s3 = scalar_lea.hbm (!%p129_p10), %s904_s2, 16  ;;  %s657_s28 = int_to_ptr.hbm [resolvable:$true] %s656_s28 }
  0x14   : > { %v161_v0 = vld [vmem:[%s903_s1 + $0x18] sm:$0xff]  ;;  %v160_v1 = vld [vmem:[%s903_s1 + $0x10] sm:$0xff]  ;;  %vm186_vm0 = vcmask 130048   ;;  %v159_v2 = vld [vmem:[%s903_s1 + $0x8] sm:$0xff]  ;;  %s150_s29 = scalar_select %p149_p11, %s712_s12, 1  ;;  %v722_v3 = vmov 0.0   ;;  %v300_v62 = vlaneseq }
  0x15   : > { %178 = vmatpush.msra.mxu0 %v161_v0  ;;  %202 = vst.msk [vmem:[#allocation2 + $0x78] sm:$0xff] %vm186_vm0, %v722_v3  ;;  %v158_v4 = vld [vmem:[%s903_s1] sm:$0xff]  ;;  %vm162_vm1 = vcmask 261120   ;;  %vm305_vm2 = vcmask 130112   ;;  %vm309_vm3 = vcmask 195712   ;;  %vm313_vm4 = vcmask 261312   ;;  %p663_p1 = scmp.lt.s32.totalorder %s657_s28, %s904_s2 }
  0x16   : > { %187 = vst.msk [vmem:[#allocation2] sm:$0xff] %vm186_vm0, %v722_v3  ;;  %s562_s4 = sshll.u32 %s150_s29, 3  ;;  %vm317_vm5 = vcmask 326912   ;;  %vm321_vm6 = vcmask 392512   ;;  %vm325_vm7 = vcmask 458112   ;;  %vm329_vm8 = vcmask 523712  }
  0x17   : > { %179 = vmatpush.msra.mxu0 %v160_v1  ;;  %188 = vst.msk [vmem:[#allocation2 + $0x8] sm:$0xff] %vm186_vm0, %v722_v3  ;;  %s152_s7 = scalar_lea.vmem %s902_s0, %s562_s4  ;;  %vm333_vm9 = vcmask 589312   ;;  %vm337_vm10 = vcmask 654912   ;;  %vm341_vm11 = vcmask 720512   ;;  %vm345_vm12 = vcmask 786112   ;;  %s658_s12 = scalar_lea.hbm %s657_s28, 8 }
  0x18   : > { %189 = vst.msk [vmem:[#allocation2 + $0x10] sm:$0xff] %vm186_vm0, %v722_v3  ;;  %v157_v5 = vld [vmem:[%s152_s7] sm:$0xff]  ;;  %vm349_vm13 = vcmask 851712   ;;  %vm353_vm14 = vcmask 917312   ;;  %vm357_vm15 = vcmask 982912   ;;  %p659_p12 = scmp.ne.s32.totalorder %s657_s28, %s658_s12  ;;  %p664_p2 = scmp.lt.s32.totalorder %s662_s3, %s658_s12 }
  0x19   : > { %180 = vmatpush.msra.mxu0 %v159_v2  ;;  %190 = vst.msk [vmem:[#allocation2 + $0x18] sm:$0xff] %vm186_vm0, %v722_v3  ;;  %v301_v2 = vand.u32 127, %v300_v62 }
  0x1a   : > { %191 = vst.msk [vmem:[#allocation2 + $0x20] sm:$0xff] %vm186_vm0, %v722_v3  ;;  %p660_p13 = pnand %p659_p12, %p778_p4  ;;  %p665_p3 = por %p664_p2, %p663_p1 }
  0x1b   : > { %181 = vmatpush.msra.mxu0 %v158_v4  ;;  %192 = vst.msk [vmem:[#allocation2 + $0x28] sm:$0xff] %vm186_vm0, %v722_v3  ;;  %v307_v4 = vadd.s32 4294967280, %v301_v2 }
  0x1c   : > { %563 = vmatmul.msk.f32.vlgmr.msra.gmra.mxu0 %vm162_vm1, %v157_v5  ;;  %v817_v6 = vld [vmem:[#allocation2 + $0x78] sm:$0xff]  ;;  %193 = vst.msk [vmem:[#allocation2 + $0x30] sm:$0xff] %vm186_vm0, %v722_v3  ;;  %v311_v5 = vadd.s32 4294967272, %v301_v2  ;;  %p661_p0 = pneg %p660_p13 }
  0x1d   : > { %564 = vmatpush.xpose.msk.msra.mxu1 %vm186_vm0, %v817_v6  ;;  %194 = vst.msk [vmem:[#allocation2 + $0x38] sm:$0xff] %vm186_vm0, %v722_v3  ;;  %v235_v54 = vmul.f32 %v817_v6, %v817_v6 }
  0x1e   : > { %195 = vst.msk [vmem:[#allocation2 + $0x40] sm:$0xff] %vm186_vm0, %v722_v3  ;;  %v205_v16 = vld [vmem:[#allocation2 + $0x8] sm:$0xff]  ;;  %p666_p5 = pnand %p665_p3, %p661_p0 }
  0x1f   : > { %196 = vst.msk [vmem:[#allocation2 + $0x48] sm:$0xff] %vm186_vm0, %v722_v3  ;;  %v206_v7 = vld [vmem:[#allocation2 + $0x10] sm:$0xff]  ;;  %v221_v18 = vmul.f32 %v205_v16, %v205_v16  ;;  %v281_v55 = vsel %vm186_vm0, %v235_v54, 0.0 }
  0x20   : > { %197 = vst.msk [vmem:[#allocation2 + $0x50] sm:$0xff] %vm186_vm0, %v722_v3  ;;  %v222_v8 = vmul.f32 %v206_v7, %v206_v7  ;;  %v207_v10 = vld [vmem:[#allocation2 + $0x18] sm:$0xff] }
  0x21   : > { %198 = vst.msk [vmem:[#allocation2 + $0x58] sm:$0xff] %vm186_vm0, %v722_v3  ;;  %v223_v11 = vmul.f32 %v207_v10, %v207_v10  ;;  %v239_v19 = vsel %vm186_vm0, %v221_v18, 0.0  ;;  %v378_v22 = vld [vmem:[#allocation2 + $0x20] sm:$0xff] }
  0x22   : > { %199 = vst.msk [vmem:[#allocation2 + $0x60] sm:$0xff] %vm186_vm0, %v722_v3  ;;  %v242_v9 = vsel %vm186_vm0, %v222_v8, 0.0  ;;  %240 = vadd.xlane.f32.xlu0 %v239_v19  ;;  %v224_v25 = vmul.f32 %v378_v22, %v378_v22  ;;  %v379_v34 = vld [vmem:[#allocation2 + $0x28] sm:$0xff] }
  0x23   : > { %200 = vst.msk [vmem:[#allocation2 + $0x68] sm:$0xff] %vm186_vm0, %v722_v3  ;;  %243 = vadd.xlane.f32.xlu1 %v242_v9  ;;  %v245_v12 = vsel %vm186_vm0, %v223_v11, 0.0  ;;  %v380_v24 = vld [vmem:[#allocation2 + $0x30] sm:$0xff]  ;;  %v225_v35 = vmul.f32 %v379_v34, %v379_v34 }
  0x24   : > { %201 = vst.msk [vmem:[#allocation2 + $0x70] sm:$0xff] %vm186_vm0, %v722_v3  ;;  %v381_v14 = vld [vmem:[#allocation2 + $0x38] sm:$0xff]  ;;  %v226_v27 = vmul.f32 %v380_v24, %v380_v24  ;;  %v248_v29 = vsel %vm186_vm0, %v224_v25, 0.0  ;;  %v303_v3 = vadd.s32 4294967288, %v301_v2 }
  0x25   : > { %v227_v15 = vmul.f32 %v381_v14, %v381_v14  ;;  %249 = vadd.xlane.f32.xlu2 %v248_v29  ;;  %v382_v33 = vld [vmem:[#allocation2 + $0x40] sm:$0xff]  ;;  %v251_v36 = vsel %vm186_vm0, %v225_v35, 0.0 }
  0x26   : > { %v254_v30 = vsel %vm186_vm0, %v226_v27, 0.0  ;;  %v383_v32 = vld [vmem:[#allocation2 + $0x48] sm:$0xff]  ;;  %v228_v39 = vmul.f32 %v382_v33, %v382_v33 }
  0x27   : > { %v257_v20 = vsel %vm186_vm0, %v227_v15, 0.0  ;;  %v384_v23 = vld [vmem:[#allocation2 + $0x50] sm:$0xff]  ;;  %v229_v38 = vmul.f32 %v383_v32, %v383_v32  ;;  %v323_v15 = vadd.s32 4294967248, %v301_v2 }
  0x28   : > { %v230_v26 = vmul.f32 %v384_v23, %v384_v23  ;;  %v385_v28 = vld [vmem:[#allocation2 + $0x58] sm:$0xff]  ;;  %v260_v42 = vsel %vm186_vm0, %v228_v39, 0.0 }
  0x29   : > { %v386_v21 = vld [vmem:[#allocation2 + $0x60] sm:$0xff]  ;;  %v263_v41 = vsel %vm186_vm0, %v229_v38, 0.0  ;;  %v231_v43 = vmul.f32 %v385_v28, %v385_v28 }
  0x2a   : > { %v387_v17 = vld [vmem:[#allocation2 + $0x68] sm:$0xff]  ;;  %v266_v31 = vsel %vm186_vm0, %v230_v26, 0.0  ;;  %255 = vadd.xlane.f32.xlu0 %v254_v30  ;;  %v232_v52 = vmul.f32 %v386_v21, %v386_v21  ;;  %v343_v30 = vadd.s32 4294967208, %v301_v2 }
  0x2b   : > { %v388_v13 = vld [vmem:[#allocation2 + $0x70] sm:$0xff]  ;;  %246 = vadd.xlane.f32.xlu1 %v245_v12  ;;  %v233_v37 = vmul.f32 %v387_v17, %v387_v17  ;;  %v269_v44 = vsel %vm186_vm0, %v231_v43, 0.0 }
  0x2c   : > { %565 = vmatpush.xpose.msk.msra.mxu1 %vm186_vm0, %v388_v13  ;;  %v234_v45 = vmul.f32 %v388_v13, %v388_v13  ;;  %v272_v53 = vsel %vm186_vm0, %v232_v52, 0.0 }
  0x2d   : > { %252 = vadd.xlane.f32.xlu2 %v251_v36  ;;  %v275_v40 = vsel %vm186_vm0, %v233_v37, 0.0 }
  0x2e   : > { %v278_v46 = vsel %vm186_vm0, %v234_v45, 0.0 }
  0x30   : > { %566 = vmatpush.xpose.msk.msra.mxu1 %vm186_vm0, %v387_v17  ;;  %v339_v17 = vadd.s32 4294967216, %v301_v2 }
  0x32   : > { %264 = vadd.xlane.f32.xlu0 %v263_v41 }
  0x33   : > { %258 = vadd.xlane.f32.xlu1 %v257_v20  ;;  %v331_v20 = vadd.s32 4294967232, %v301_v2 }
  0x34   : > { %567 = vmatpush.xpose.msk.msra.mxu1 %vm186_vm0, %v386_v21 }
  0x35   : > { %261 = vadd.xlane.f32.xlu2 %v260_v42 }
  0x38   : > { %568 = vmatpush.xpose.msk.msra.mxu1 %vm186_vm0, %v385_v28  ;;  %v351_v28 = vadd.s32 4294967192, %v301_v2 }
  0x3b   : > { %267 = vadd.xlane.f32.xlu1 %v266_v31 }
  0x3c   : > { %569 = vmatpush.xpose.msk.msra.mxu1 %vm186_vm0, %v384_v23  ;;  %v335_v23 = vadd.s32 4294967224, %v301_v2 }
  0x3d   : > { %270 = vadd.xlane.f32.xlu2 %v269_v44 }
  0x40   : > { %570 = vmatpush.xpose.msk.msra.mxu1 %vm186_vm0, %v383_v32 }
  0x43   : > { %276 = vadd.xlane.f32.xlu1 %v275_v40  ;;  %v355_v40 = vadd.s32 4294967184, %v301_v2 }
  0x44   : > { %571 = vmatpush.xpose.msk.msra.mxu1 %vm186_vm0, %v382_v33  ;;  %v347_v33 = vadd.s32 4294967200, %v301_v2 }
  0x45   : > { %279 = vadd.xlane.f32.xlu2 %v278_v46 }
  0x48   : > { %572 = vmatpush.xpose.msk.msra.mxu1 %vm186_vm0, %v381_v14  ;;  %v327_v14 = vadd.s32 4294967240, %v301_v2 }
  0x4c   : > { %573 = vmatpush.xpose.msk.msra.mxu1 %vm186_vm0, %v380_v24 }
  0x50   : > { %574 = vmatpush.xpose.msk.msra.mxu1 %vm186_vm0, %v379_v34 }
  0x54   : > { %575 = vmatpush.xpose.msk.msra.mxu1 %vm186_vm0, %v378_v22 }
  0x58   : > { %576 = vmatpush.xpose.msk.msra.mxu1 %vm186_vm0, %v207_v10  ;;  %v319_v10 = vadd.s32 4294967256, %v301_v2 }
  0x5c   : > { %577 = vmatpush.xpose.msk.msra.mxu1 %vm186_vm0, %v206_v7  ;;  %v315_v7 = vadd.s32 4294967264, %v301_v2 }
  0x60   : > { %578 = vmatpush.xpose.msk.msra.mxu1 %vm186_vm0, %v205_v16 }
  0x95   : > { %v241_v57 = vpop.xlane.xlu0 %240 }
  0x96   : > { %v244_v56 = vpop.xlane.xlu1 %243  ;;  %v304_v9 = vperm.slane %v241_v57, %v303_v3 }
  0x97   : > { %v308_v13 = vperm.slane %v244_v56, %v307_v4 }
  0x98   : > { %v250_v58 = vpop.xlane.xlu2 %249 }
  0x99   : > { %v183_v47 = vpop.f32.mrf.mxu0  ;;  %v316_v19 = vperm.slane %v250_v58, %v315_v7 }
  0x9a   : > { %203 = vst.msk [vmem:[#allocation2] sm:$0xff] %vm186_vm0, %v183_v47 }
  0x9d   : > { %v256_v60 = vpop.xlane.xlu0 %255 }
  0x9e   : > { %v247_v59 = vpop.xlane.xlu1 %246  ;;  %v324_v26 = vperm.slane %v256_v60, %v323_v15 }
  0x9f   : > { %v312_v16 = vperm.slane %v247_v59, %v311_v5 }
  0xa0   : > { %v253_v61 = vpop.xlane.xlu2 %252 }
  0xa1   : > { %v374_v48 = vld [vmem:[#allocation2] sm:$0xff]  ;;  %v320_v22 = vperm.slane %v253_v61, %v319_v10 }
  0xa2   : > { %579 = vmatpush.xpose.msk.msra.mxu1 %vm186_vm0, %v374_v48  ;;  %v373_v49 = vadd.f32 %v374_v48, %v374_v48  ;;  %v368_v50 = vmul.f32 %v374_v48, %v374_v48  ;;  %v359_v48 = vadd.s32 4294967176, %v301_v2 }
  0xa4   : > { %v370_v51 = vsel %vm186_vm0, %v368_v50, 0.0 }
  0xa5   : > { %580 = vmatmul.msk.f32.vlgmr.msra.gmra.mxu1 %vm186_vm0, %v373_v49  ;;  %371 = vadd.xlane.f32.xlu1 %v370_v51  ;;  %v265_v0 = vpop.xlane.xlu0 %264  ;;  %vm361_vm0 = vcmask 1048512  }
  0xa6   : > { %237 = vadd.xlane.f32.xlu0 %v370_v51  ;;  %v259_v63 = vpop.xlane.xlu1 %258  ;;  %v336_v35 = vperm.slane %v265_v0, %v335_v23 }
  0xa7   : > { %v328_v25 = vperm.slane %v259_v63, %v327_v14 }
  0xa8   : > { %v262_v1 = vpop.xlane.xlu2 %261 }
  0xa9   : > { %v332_v31 = vperm.slane %v262_v1, %v331_v20 }
  0xae   : > { %273 = vadd.xlane.f32.xlu0 %v272_v53  ;;  %v268_v8 = vpop.xlane.xlu1 %267 }
  0xaf   : > { %v340_v37 = vperm.slane %v268_v8, %v339_v17 }
  0xb0   : > { %v271_v12 = vpop.xlane.xlu2 %270 }
  0xb1   : > { %v344_v43 = vperm.slane %v271_v12, %v343_v30 }
  0xb6   : > { %282 = vadd.xlane.f32.xlu0 %v281_v55  ;;  %v277_v38 = vpop.xlane.xlu1 %276 }
  0xb7   : > { %v352_v41 = vperm.slane %v277_v38, %v351_v28 }
  0xb8   : > { %v280_v44 = vpop.xlane.xlu2 %279 }
  0xb9   : > { %v356_v50 = vperm.slane %v280_v44, %v355_v40 }
 0x118   : > { %v372_v57 = vpop.xlane.xlu1 %371 }
 0x119   : > { %v238_v6 = vpop.xlane.xlu0 %237 }
 0x11a   : > { %v302_v11 = vperm.slane %v238_v6, %v301_v2 }
 0x11c   : > { %v306_v18 = vsel %vm305_vm2, %v304_v9, %v302_v11 }
 0x11d   : > { %v310_v21 = vsel %vm309_vm3, %v308_v13, %v306_v18 }
 0x11e   : > { %v314_v24 = vsel %vm313_vm4, %v312_v16, %v310_v21 }
 0x11f   : > { %v318_v27 = vsel %vm317_vm5, %v316_v19, %v314_v24 }
 0x120   : > { %v322_v29 = vsel %vm321_vm6, %v320_v22, %v318_v27 }
 0x121   : > { %v326_v32 = vsel %vm325_vm7, %v324_v26, %v322_v29  ;;  %v274_v34 = vpop.xlane.xlu0 %273 }
 0x122   : > { %v330_v36 = vsel %vm329_vm8, %v328_v25, %v326_v32  ;;  %v348_v46 = vperm.slane %v274_v34, %v347_v33  ;;  %v458_v59 = vpop.f32.mrf.mxu1 }
 0x123   : > { %v334_v39 = vsel %vm333_vm9, %v332_v31, %v330_v36 }
 0x124   : > { %v338_v42 = vsel %vm337_vm10, %v336_v35, %v334_v39 }
 0x125   : > { %v342_v45 = vsel %vm341_vm11, %v340_v37, %v338_v42 }
 0x126   : > { %v346_v47 = vsel %vm345_vm12, %v344_v43, %v342_v45 }
 0x127   : > { %v350_v49 = vsel %vm349_vm13, %v348_v46, %v346_v47 }
 0x128   : > { %v354_v51 = vsel %vm353_vm14, %v352_v41, %v350_v49 }
 0x129   : > { %v283_v52 = vpop.xlane.xlu0 %282  ;;  %v358_v54 = vsel %vm357_vm15, %v356_v50, %v354_v51 }
 0x12a   : > { %v360_v53 = vperm.slane %v283_v52, %v359_v48 }
 0x12c   : > { %v362_v55 = vsel %vm361_vm0, %v360_v53, %v358_v54 }
 0x12d   : > { %364 = vst [vmem:[#allocation3] sm:$0x1] %v362_v55 }
 0x134   : > { %v641_v56 = vld [vmem:[#allocation3] ss:$0 sm:$0xff] }
 0x135   : > { %v465_v58 = vadd.f32 %v641_v56, %v372_v57 }
 0x137   : > { %v466_v60 = vsub.f32 %v465_v58, %v458_v59 }
 0x139   : > { %v467_v61 = vmax.f32 %v466_v60, 0.0 }
 0x13b   : > { %468 = vst [vmem:[%s148_s24] sm:$0xff] %v467_v61 }
 0x13c   : > { %669 = shalt.err (!%p666_p5)
}
 0x13d   : > { %585 = dma.vmem_to_hbm [thread:$0]  (%p778_p4), %s484_s25, 128, %s486_s26, %s470_s27  }
 0x13e PF: > { %p591_p6 = scmp.ge.s32.totalorder %s720_s14, 2  ;;  %s497_s6 = sand.u32 1, %s700_s9  }
 0x13f   : > { %s498_s7 = scalar_lea.sflag [#allocation5], %s497_s6 }
 0x140   : > { %p588_p7 = pnand %p591_p6, %p785_p8 }
 0x142   : > { %p589_p9 = pneg %p588_p7 }
 0x144   : > { %695 = dma.done.wait (%p589_p9), %s498_s7, 128  }
 0x145   : > { %697 = vsyncadd (%p589_p9), %s498_s7, 4294967168  ;;  %s15_s14 = sadd.s32 1, %s720_s14   ;;  %s907_s9 = smov %s704_s10 }
 0x146   : > { %p12_p10 = scmp.ge.s32.totalorder %s15_s14, 4   ;;  %s908_s10 = smov %s708_s11 }
 0x147   : > { %s909_s11 = smov %s791_s22  ;;  %s910_s12 = smov %s716_s13 }
 0x148   : > { %s911_s13 = smov %s913_s17  ;;  %14 = sbr.rel (!%p12_p10) target bundleno = 4 (0x4), region = 68 }
 0x14d   :  { %504 = vsyncpa [#allocation5], 1 }
 0x14e   :  { %506 = vsyncpa [#allocation5 + $0x1], 1 }

</bundles_post_ra>
